<compile_context>
chip_gen: v7x
topology: tpu7x:2x2x1
jax: 0.10.0
libtpu: 0.0.40
codegen_flags: <defaults>
</compile_context>

<pallas_src>
import jax
import jax.numpy as jnp
from jax.experimental import pallas as pl
from jax.experimental.pallas import tpu as pltpu


def _small_matmul_fma(a, b):
    """a:(P,Q) @ b:(Q,N) with tiny Q, via VPU broadcast FMAs (f32 accumulate)."""
    a = a.astype(jnp.float32)
    b = b.astype(jnp.float32)
    acc = a[:, 0:1] * b[0:1, :]
    for q in range(1, a.shape[1]):
        acc = acc + a[:, q : q + 1] * b[q : q + 1, :]
    return acc


def _bmm_chain_kernel(w1_ref, x_ref, w2_ref, o_ref):
    # w1_ref: (B*M, K), x_ref: (K, S), w2_ref: (S, N), o_ref: (B*M, N)
    # Reassociate: (w1 @ x1) @ w2 == w1 @ (x1 @ w2). Depth-2 contractions on VPU.
    xw2 = _small_matmul_fma(x_ref[...], w2_ref[...])      # (K, N), computed once
    out = _small_matmul_fma(w1_ref[...], xw2)             # (B*M, N), lane-dense N
    o_ref[...] = out.astype(o_ref.dtype)


def bmm_chain(w1, x1, w2):
    """Computes (w1 @ x1) @ w2 with batch broadcasting (x1/w2 batch == 1)."""
    B, M, K = w1.shape
    b_x, K2, S = x1.shape
    b_w2, S2, N = w2.shape
    assert K == K2 and S == S2, "inner dims must match"
    assert b_x == 1 and b_w2 == 1, "x1/w2 broadcast over batch"

    R = B * M
    w1_flat = jnp.reshape(w1, (R, K))   # contiguous leading-dim collapse, free
    x_2d = jnp.reshape(x1, (K, S))
    w2_2d = jnp.reshape(w2, (S, N))

    itemsize = jnp.dtype(w1.dtype).itemsize
    cost = pl.CostEstimate(
        flops=2 * K * S * N + 2 * R * K * N,
        transcendentals=0,
        bytes_accessed=(R * K + K * S + S * N + R * N) * itemsize,
    )

    out_flat = pl.pallas_call(
        _bmm_chain_kernel,
        out_shape=jax.ShapeDtypeStruct((R, N), w1.dtype),
        # Gridless: whole arrays land in VMEM once; no per-step pipeline overhead.
        in_specs=[
            pl.BlockSpec(memory_space=pltpu.MemorySpace.VMEM),
            pl.BlockSpec(memory_space=pltpu.MemorySpace.VMEM),
            pl.BlockSpec(memory_space=pltpu.MemorySpace.VMEM),
        ],
        out_specs=pl.BlockSpec(memory_space=pltpu.MemorySpace.VMEM),
        cost_estimate=cost,
    )(w1_flat, x_2d, w2_2d)

    return jnp.reshape(out_flat, (B, M, N))


class Model:
    """JAX mirror of the torch module: two chained broadcast batched matmuls."""

    def __init__(self, key, B=16, M=27, K=2, S=2, N=128):
        k1, k2 = jax.random.split(key)
        # torch.rand -> uniform [0, 1)
        self.w1 = jax.random.uniform(k1, (B, M, K), dtype=jnp.float32)
        self.w2 = jax.random.uniform(k2, (1, S, N), dtype=jnp.float32)

    def __call__(self, x1):
        return bmm_chain(self.w1, x1, self.w2)


if __name__ == "__main__":
    key = jax.random.PRNGKey(0)
    kx, kp = jax.random.split(key)

    # Small, self-consistent stand-ins for the (inconsistent) original shapes.
    # N=128 is lane-dense (original N was 384, also a multiple of 128).
    B, M, K, S, N = 16, 27, 2, 2, 128
    model = Model(kp, B=B, M=M, K=K, S=S, N=N)

    # x1 analogous to torch.randn(1, K, S)
    x1 = jax.random.normal(kx, (1, K, S), dtype=jnp.float32)

    out = model(x1)
    out = jax.block_until_ready(out)

    # Pure-JAX reference for the same broadcast-bmm chain (original association,
    # full-precision f32 matmuls so the comparison is not polluted by bf16 passes).
    hp = jax.lax.Precision.HIGHEST
    ref = jnp.matmul(jnp.matmul(model.w1, x1, precision=hp), model.w2, precision=hp)
    assert out.shape == (B, M, N)
    assert jnp.allclose(out, ref, atol=1e-5, rtol=1e-5)

    print("KERNEL_OK")
</pallas_src>

<mosaic_0001>
module attributes {stable_mosaic.version = 11 : i64} {
  func.func @_bmm_chain_kernel(%arg0: memref<432x2xf32, #tpu.memory_space<vmem>>, %arg1: memref<2x2xf32, #tpu.memory_space<vmem>>, %arg2: memref<2x128xf32, #tpu.memory_space<vmem>>, %arg3: memref<432x128xf32, #tpu.memory_space<vmem>>) attributes {dimension_semantics = [], scalar_prefetch = 0 : i64, scratch_operands = 0 : i64, tpu.core_type = #tpu.core_type<tc>} {
    %c0 = arith.constant 0 : index
    %c0_0 = arith.constant 0 : index
    %0 = vector.load %arg1[%c0, %c0_0] : memref<2x2xf32, #tpu.memory_space<vmem>>, vector<2x2xf32>
    %c0_1 = arith.constant 0 : index
    %c0_2 = arith.constant 0 : index
    %1 = vector.load %arg2[%c0_1, %c0_2] : memref<2x128xf32, #tpu.memory_space<vmem>>, vector<2x128xf32>
    %2 = vector.extract_strided_slice %0 {offsets = [0, 0], sizes = [2, 1], strides = [1, 1]} : vector<2x2xf32> to vector<2x1xf32>
    %3 = vector.extract_strided_slice %1 {offsets = [0, 0], sizes = [1, 128], strides = [1, 1]} : vector<2x128xf32> to vector<1x128xf32>
    %4 = vector.broadcast %2 : vector<2x1xf32> to vector<2x128xf32>
    %5 = vector.broadcast %3 : vector<1x128xf32> to vector<2x128xf32>
    %6 = arith.mulf %4, %5 : vector<2x128xf32>
    %7 = vector.extract_strided_slice %0 {offsets = [0, 1], sizes = [2, 1], strides = [1, 1]} : vector<2x2xf32> to vector<2x1xf32>
    %8 = vector.extract_strided_slice %1 {offsets = [1, 0], sizes = [1, 128], strides = [1, 1]} : vector<2x128xf32> to vector<1x128xf32>
    %9 = vector.broadcast %7 : vector<2x1xf32> to vector<2x128xf32>
    %10 = vector.broadcast %8 : vector<1x128xf32> to vector<2x128xf32>
    %11 = arith.mulf %9, %10 : vector<2x128xf32>
    %12 = arith.addf %6, %11 : vector<2x128xf32>
    %c0_3 = arith.constant 0 : index
    %c0_4 = arith.constant 0 : index
    %13 = vector.load %arg0[%c0_3, %c0_4] : memref<432x2xf32, #tpu.memory_space<vmem>>, vector<432x2xf32>
    %14 = vector.extract_strided_slice %13 {offsets = [0, 0], sizes = [432, 1], strides = [1, 1]} : vector<432x2xf32> to vector<432x1xf32>
    %15 = vector.extract_strided_slice %12 {offsets = [0, 0], sizes = [1, 128], strides = [1, 1]} : vector<2x128xf32> to vector<1x128xf32>
    %16 = vector.broadcast %14 : vector<432x1xf32> to vector<432x128xf32>
    %17 = vector.broadcast %15 : vector<1x128xf32> to vector<432x128xf32>
    %18 = arith.mulf %16, %17 : vector<432x128xf32>
    %19 = vector.extract_strided_slice %13 {offsets = [0, 1], sizes = [432, 1], strides = [1, 1]} : vector<432x2xf32> to vector<432x1xf32>
    %20 = vector.extract_strided_slice %12 {offsets = [1, 0], sizes = [1, 128], strides = [1, 1]} : vector<2x128xf32> to vector<1x128xf32>
    %21 = vector.broadcast %19 : vector<432x1xf32> to vector<432x128xf32>
    %22 = vector.broadcast %20 : vector<1x128xf32> to vector<432x128xf32>
    %23 = arith.mulf %21, %22 : vector<432x128xf32>
    %24 = arith.addf %18, %23 : vector<432x128xf32>
    %c0_5 = arith.constant 0 : index
    %c0_6 = arith.constant 0 : index
    %25 = vector.load %arg3[%c0_5, %c0_6] : memref<432x128xf32, #tpu.memory_space<vmem>>, vector<432x128xf32>
    tpu.vector_store %arg3[%c0_5, %c0_6], %24 {strides = array<i32>} : memref<432x128xf32, #tpu.memory_space<vmem>>, vector<432x128xf32>,
    return
  }
}

</mosaic_0001>

<bundles_post_ra>
// kernel: tpu_custom_call.1
= control target key start
LH: loop header
LB: loop body
LE: loop exit
PB: predicated region body
PF: predicated region fallthrough
CT: control target
= control target key end

     0   :  { %v850_v2 = vmov 0   ;;  %s1552_s0 = inlined_call_operand.vmem [shape: f32[432,2], index: 0, kind: input, shape index: {}]   ;;  %s1553_s1 = inlined_call_operand.vmem [shape: f32[2,2], index: 1, kind: input, shape index: {}]   ;;  %s1554_s2 = inlined_call_operand.vmem [shape: f32[2,128], index: 2, kind: input, shape index: {}]   ;;  %s1555_s3 = inlined_call_operand.hbm [shape: f32[432,128], index: 3, kind: output, shape index: {}]  }
   0x1   :  { %v878_v0 = vld [vmem:[%s1552_s0] sm:$0xff]  ;;  %823 = vset.pattern.permute.xlu1 %v850_v2  ;;  %822 = vset.pattern.permute.xlu0 %v850_v2  ;;  %v890_v3 = vld [vmem:[%s1552_s0 + $0x8] sm:$0xff]  ;;  %v895_v4 = vld [vmem:[%s1552_s0 + $0x18] sm:$0xff] }
   0x2   :  { %v883_v1 = vld [vmem:[%s1553_s1] sm:$0x3]  ;;  %93 = vperm.xlu1 %823, %v878_v0   ;;  %v902_v5 = vld [vmem:[%s1552_s0 + $0x10] sm:$0xff]  ;;  %v926_v9 = vld [vmem:[%s1552_s0 + $0x28] sm:$0xff] }
   0x3   :  { %19 = vperm.xlu0 %822, %v883_v1   ;;  %v907_v6 = vld [vmem:[%s1552_s0 + $0x30] sm:$0xff]  ;;  %v914_v7 = vld [vmem:[%s1552_s0 + $0x20] sm:$0xff] }
   0x4   :  { %v919_v8 = vld [vmem:[%s1552_s0 + $0x40] sm:$0xff]  ;;  %v931_v10 = vld [vmem:[%s1552_s0 + $0x50] sm:$0xff] }
   0x6   :  { %98 = vperm.xlu1 %823, %v890_v3  }
   0x7   :  { %108 = vperm.xlu0 %822, %v895_v4  }
   0xa   :  { %103 = vperm.xlu1 %823, %v902_v5  }
   0xb   :  { %123 = vperm.xlu0 %822, %v907_v6  }
   0xe   :  { %113 = vperm.xlu1 %823, %v914_v7  }
   0xf   :  { %133 = vperm.xlu0 %822, %v919_v8  }
  0x12   :  { %118 = vperm.xlu1 %823, %v926_v9  }
  0x13   :  { %143 = vperm.xlu0 %822, %v931_v10  }
  0x14   :  { %8 = vsyncpa [#allocation3], 0  ;;  %v938_v11 = vld [vmem:[%s1552_s0 + $0x38] sm:$0xff]  ;;  %v943_v12 = vld [vmem:[%s1552_s0 + $0x60] sm:$0xff]  ;;  %v851_v54 = vmov 1  }
  0x15   :  { %v950_v13 = vld [vmem:[%s1552_s0 + $0x48] sm:$0xff]  ;;  %v955_v14 = vld [vmem:[%s1552_s0 + $0x70] sm:$0xff]  ;;  %v962_v15 = vld [vmem:[%s1552_s0 + $0x58] sm:$0xff] }
  0x16   :  { %128 = vperm.xlu1 %823, %v938_v11   ;;  %v967_v16 = vld [vmem:[%s1552_s0 + $0x80] sm:$0xff]  ;;  %v974_v17 = vld [vmem:[%s1552_s0 + $0x68] sm:$0xff]  ;;  %v979_v18 = vld [vmem:[%s1552_s0 + $0x90] sm:$0xff] }
  0x17   :  { %153 = vperm.xlu0 %822, %v943_v12   ;;  %v986_v19 = vld [vmem:[%s1552_s0 + $0x78] sm:$0xff]  ;;  %v991_v20 = vld [vmem:[%s1552_s0 + $0xa0] sm:$0xff]  ;;  %v998_v21 = vld [vmem:[%s1552_s0 + $0x88] sm:$0xff] }
  0x18   :  { %v1003_v22 = vld [vmem:[%s1552_s0 + $0xb0] sm:$0xff]  ;;  %v1010_v23 = vld [vmem:[%s1552_s0 + $0x98] sm:$0xff]  ;;  %v1015_v24 = vld [vmem:[%s1552_s0 + $0xc0] sm:$0xff] }
  0x19   :  { %v1022_v25 = vld [vmem:[%s1552_s0 + $0xa8] sm:$0xff]  ;;  %v1027_v26 = vld [vmem:[%s1552_s0 + $0xd0] sm:$0xff]  ;;  %v1034_v27 = vld [vmem:[%s1552_s0 + $0xb8] sm:$0xff] }
  0x1a   :  { %138 = vperm.xlu1 %823, %v950_v13   ;;  %v1039_v28 = vld [vmem:[%s1552_s0 + $0xe0] sm:$0xff]  ;;  %v1046_v29 = vld [vmem:[%s1552_s0 + $0xc8] sm:$0xff]  ;;  %v1051_v30 = vld [vmem:[%s1552_s0 + $0xf0] sm:$0xff] }
  0x1b   :  { %163 = vperm.xlu0 %822, %v955_v14   ;;  %v1058_v31 = vld [vmem:[%s1552_s0 + $0xd8] sm:$0xff]  ;;  %v1063_v32 = vld [vmem:[%s1552_s0 + $0x100] sm:$0xff]  ;;  %v1070_v33 = vld [vmem:[%s1552_s0 + $0xe8] sm:$0xff] }
  0x1c   :  { %v1075_v34 = vld [vmem:[%s1552_s0 + $0x110] sm:$0xff]  ;;  %v1082_v35 = vld [vmem:[%s1552_s0 + $0xf8] sm:$0xff]  ;;  %v1087_v36 = vld [vmem:[%s1552_s0 + $0x120] sm:$0xff] }
  0x1d   :  { %v1094_v37 = vld [vmem:[%s1552_s0 + $0x108] sm:$0xff]  ;;  %v1099_v38 = vld [vmem:[%s1552_s0 + $0x130] sm:$0xff]  ;;  %v1106_v39 = vld [vmem:[%s1552_s0 + $0x118] sm:$0xff] }
  0x1e   :  { %148 = vperm.xlu1 %823, %v962_v15   ;;  %v1111_v40 = vld [vmem:[%s1552_s0 + $0x140] sm:$0xff]  ;;  %v1118_v41 = vld [vmem:[%s1552_s0 + $0x128] sm:$0xff]  ;;  %v1123_v42 = vld [vmem:[%s1552_s0 + $0x150] sm:$0xff] }
  0x1f   :  { %173 = vperm.xlu0 %822, %v967_v16   ;;  %v1130_v43 = vld [vmem:[%s1552_s0 + $0x138] sm:$0xff]  ;;  %v1135_v44 = vld [vmem:[%s1552_s0 + $0x160] sm:$0xff]  ;;  %v1142_v45 = vld [vmem:[%s1552_s0 + $0x148] sm:$0xff] }
  0x20   :  { %v1147_v46 = vld [vmem:[%s1552_s0 + $0x170] sm:$0xff]  ;;  %v1154_v47 = vld [vmem:[%s1552_s0 + $0x158] sm:$0xff]  ;;  %v1159_v48 = vld [vmem:[%s1552_s0 + $0x180] sm:$0xff] }
  0x21   :  { %v1166_v49 = vld [vmem:[%s1552_s0 + $0x168] sm:$0xff]  ;;  %v1171_v50 = vld [vmem:[%s1552_s0 + $0x190] sm:$0xff]  ;;  %v1178_v51 = vld [vmem:[%s1552_s0 + $0x178] sm:$0xff] }
  0x22   :  { %158 = vperm.xlu1 %823, %v974_v17   ;;  %v1183_v52 = vld [vmem:[%s1552_s0 + $0x1a0] sm:$0xff]  ;;  %v1190_v53 = vld [vmem:[%s1552_s0 + $0x188] sm:$0xff]  ;;  %v1197_v55 = vld [vmem:[%s1552_s0 + $0x198] sm:$0xff] }
  0x23   :  { %183 = vperm.xlu0 %822, %v979_v18   ;;  %v1204_v56 = vld [vmem:[%s1552_s0 + $0x1a8] sm:$0xff] }
  0x26   :  { %168 = vperm.xlu1 %823, %v986_v19  }
  0x27   :  { %193 = vperm.xlu0 %822, %v991_v20  }
  0x2a   :  { %178 = vperm.xlu1 %823, %v998_v21  }
  0x2b   :  { %203 = vperm.xlu0 %822, %v1003_v22  }
  0x2e   :  { %188 = vperm.xlu1 %823, %v1010_v23  }
  0x2f   :  { %213 = vperm.xlu0 %822, %v1015_v24  }
  0x32   :  { %198 = vperm.xlu1 %823, %v1022_v25  }
  0x33   :  { %223 = vperm.xlu0 %822, %v1027_v26  }
  0x36   :  { %208 = vperm.xlu1 %823, %v1034_v27  }
  0x37   :  { %233 = vperm.xlu0 %822, %v1039_v28  }
  0x3a   :  { %218 = vperm.xlu1 %823, %v1046_v29  }
  0x3b   :  { %243 = vperm.xlu0 %822, %v1051_v30  }
  0x3e   :  { %228 = vperm.xlu1 %823, %v1058_v31  }
  0x3f   :  { %253 = vperm.xlu0 %822, %v1063_v32  }
  0x42   :  { %238 = vperm.xlu1 %823, %v1070_v33  }
  0x43   :  { %263 = vperm.xlu0 %822, %v1075_v34  }
  0x46   :  { %248 = vperm.xlu1 %823, %v1082_v35  }
  0x47   :  { %273 = vperm.xlu0 %822, %v1087_v36  }
  0x4a   :  { %258 = vperm.xlu1 %823, %v1094_v37  }
  0x4b   :  { %283 = vperm.xlu0 %822, %v1099_v38  }
  0x4e   :  { %268 = vperm.xlu1 %823, %v1106_v39  }
  0x4f   :  { %293 = vperm.xlu0 %822, %v1111_v40  }
  0x52   :  { %278 = vperm.xlu1 %823, %v1118_v41  }
  0x53   :  { %303 = vperm.xlu0 %822, %v1123_v42  }
  0x56   :  { %288 = vperm.xlu1 %823, %v1130_v43  }
  0x57   :  { %313 = vperm.xlu0 %822, %v1135_v44  }
  0x5a   :  { %298 = vperm.xlu1 %823, %v1142_v45  }
  0x5b   :  { %323 = vperm.xlu0 %822, %v1147_v46  }
  0x5e   :  { %308 = vperm.xlu1 %823, %v1154_v47  }
  0x5f   :  { %333 = vperm.xlu0 %822, %v1159_v48  }
  0x62   :  { %318 = vperm.xlu1 %823, %v1166_v49  }
  0x63   :  { %343 = vperm.xlu0 %822, %v1171_v50  }
  0x66   :  { %328 = vperm.xlu1 %823, %v1178_v51  }
  0x67   :  { %353 = vperm.xlu0 %822, %v1183_v52  }
  0x6a   :  { %338 = vperm.xlu1 %823, %v1190_v53  }
  0x6b   :  { %824 = vset.pattern.permute.xlu0 %v851_v54 }
  0x6c   :  { %28 = vperm.xlu0 %824, %v883_v1  }
  0x6e   :  { %348 = vperm.xlu1 %823, %v1197_v55  }
  0x70   :  { %420 = vperm.xlu0 %824, %v878_v0  }
  0x72   :  { %358 = vperm.xlu1 %823, %v1204_v56  }
  0x74   :  { %432 = vperm.xlu0 %824, %v895_v4  }
  0x76   :  { %825 = vset.pattern.permute.xlu1 %v851_v54 }
  0x77   :  { %424 = vperm.xlu1 %825, %v890_v3  }
  0x78   :  { %440 = vperm.xlu0 %824, %v926_v9  }
  0x7b   :  { %428 = vperm.xlu1 %825, %v902_v5  }
  0x7c   :  { %448 = vperm.xlu0 %824, %v938_v11  }
  0x7f   :  { %436 = vperm.xlu1 %825, %v914_v7  }
  0x80   :  { %456 = vperm.xlu0 %824, %v950_v13  }
  0x81   :  { %v1214_v57 = vpop.permute.xlu1 %93 }
  0x82   :  { %v1216_v58 = vpop.permute.xlu0 %19 }
  0x83   :  { %444 = vperm.xlu1 %825, %v907_v6  }
  0x84   :  { %464 = vperm.xlu0 %824, %v962_v15  }
  0x85   :  { %v1220_v59 = vpop.permute.xlu1 %98 }
  0x86   :  { %v1222_v60 = vpop.permute.xlu0 %108 }
  0x87   :  { %452 = vperm.xlu1 %825, %v919_v8  }
  0x88   :  { %472 = vperm.xlu0 %824, %v974_v17  }
  0x89   :  { %v1226_v61 = vpop.permute.xlu1 %103 }
  0x8a   :  { %v1228_v62 = vpop.permute.xlu0 %123 }
  0x8b   :  { %460 = vperm.xlu1 %825, %v931_v10  }
  0x8c   :  { %480 = vperm.xlu0 %824, %v986_v19  }
  0x8d   :  { %v1232_v63 = vpop.permute.xlu1 %113 }
  0x8e   :  { %v1234_v0 = vpop.permute.xlu0 %133 }
  0x8f   :  { %468 = vperm.xlu1 %825, %v943_v12  }
  0x90   :  { %488 = vperm.xlu0 %824, %v998_v21  }
  0x91   :  { %v1238_v1 = vpop.permute.xlu1 %118 }
  0x92   :  { %v1240_v2 = vpop.permute.xlu0 %143 }
  0x93   :  { %476 = vperm.xlu1 %825, %v955_v14  }
  0x94   :  { %496 = vperm.xlu0 %824, %v1010_v23  }
  0x95   :  { %v1244_v3 = vpop.permute.xlu1 %128 }
  0x96   :  { %v1246_v4 = vpop.permute.xlu0 %153 }
  0x97   :  { %484 = vperm.xlu1 %825, %v967_v16  }
  0x98   :  { %504 = vperm.xlu0 %824, %v1022_v25  }
  0x99   :  { %v1250_v5 = vpop.permute.xlu1 %138 }
  0x9a   :  { %v1252_v6 = vpop.permute.xlu0 %163 }
  0x9b   :  { %492 = vperm.xlu1 %825, %v979_v18  }
  0x9c   :  { %512 = vperm.xlu0 %824, %v1034_v27  }
  0x9d   :  { %v1256_v7 = vpop.permute.xlu1 %148 }
  0x9e   :  { %v1258_v8 = vpop.permute.xlu0 %173 }
  0x9f   :  { %500 = vperm.xlu1 %825, %v991_v20  }
  0xa0   :  { %520 = vperm.xlu0 %824, %v1046_v29  }
  0xa1   :  { %v1262_v9 = vpop.permute.xlu1 %158 }
  0xa2   :  { %v1264_v10 = vpop.permute.xlu0 %183 }
  0xa3   :  { %508 = vperm.xlu1 %825, %v1003_v22  }
  0xa4   :  { %528 = vperm.xlu0 %824, %v1058_v31  }
  0xa5   :  { %v1268_v11 = vpop.permute.xlu1 %168 }
  0xa6   :  { %v1270_v12 = vpop.permute.xlu0 %193 }
  0xa7   :  { %516 = vperm.xlu1 %825, %v1015_v24  }
  0xa8   :  { %536 = vperm.xlu0 %824, %v1070_v33  }
  0xa9   :  { %v1274_v13 = vpop.permute.xlu1 %178 }
  0xaa   :  { %v1276_v14 = vpop.permute.xlu0 %203 }
  0xab   :  { %524 = vperm.xlu1 %825, %v1027_v26  }
  0xac   :  { %544 = vperm.xlu0 %824, %v1082_v35  }
  0xad   :  { %v1280_v15 = vpop.permute.xlu1 %188 }
  0xae   :  { %v1282_v16 = vpop.permute.xlu0 %213 }
  0xaf   :  { %532 = vperm.xlu1 %825, %v1039_v28  }
  0xb0   :  { %552 = vperm.xlu0 %824, %v1094_v37  }
  0xb1   :  { %v1286_v17 = vpop.permute.xlu1 %198 }
  0xb2   :  { %v1288_v18 = vpop.permute.xlu0 %223 }
  0xb3   :  { %540 = vperm.xlu1 %825, %v1051_v30  }
  0xb4   :  { %560 = vperm.xlu0 %824, %v1106_v39  }
  0xb5   :  { %v1292_v19 = vpop.permute.xlu1 %208 }
  0xb6   :  { %v1294_v20 = vpop.permute.xlu0 %233 }
  0xb7   :  { %548 = vperm.xlu1 %825, %v1063_v32  }
  0xb8   :  { %568 = vperm.xlu0 %824, %v1118_v41   ;;  %v22_v41 = vlaneseq }
  0xb9   :  { %v1298_v21 = vpop.permute.xlu1 %218 }
  0xba   :  { %v1300_v22 = vpop.permute.xlu0 %243 }
  0xbb   :  { %1556 = vst [vmem:[#allocation5_spill] sm:$0xff] %v1300_v22  ;;  %556 = vperm.xlu1 %825, %v1075_v34  }
  0xbc   :  { %576 = vperm.xlu0 %824, %v1130_v43  }
  0xbd   :  { %v1304_v23 = vpop.permute.xlu1 %228 }
  0xbe   :  { %v1306_v24 = vpop.permute.xlu0 %253 }
  0xbf   :  { %1557 = vst [vmem:[#allocation6_spill] sm:$0xff] %v1306_v24  ;;  %564 = vperm.xlu1 %825, %v1087_v36  }
  0xc0   :  { %584 = vperm.xlu0 %824, %v1142_v45  }
  0xc1   :  { %v1310_v25 = vpop.permute.xlu1 %238 }
  0xc2   :  { %v1312_v26 = vpop.permute.xlu0 %263 }
  0xc3   :  { %1558 = vst [vmem:[#allocation7_spill] sm:$0xff] %v1312_v26  ;;  %572 = vperm.xlu1 %825, %v1099_v38  }
  0xc4   :  { %592 = vperm.xlu0 %824, %v1154_v47  }
  0xc5   :  { %v1316_v27 = vpop.permute.xlu1 %248 }
  0xc6   :  { %v274_v28 = vpop.permute.xlu0 %273 }
  0xc7   :  { %580 = vperm.xlu1 %825, %v1111_v40  }
  0xc8   :  { %600 = vperm.xlu0 %824, %v1166_v49  }
  0xc9   :  { %v1320_v29 = vpop.permute.xlu1 %258 }
  0xca   :  { %1559 = vst [vmem:[#allocation8_spill] sm:$0xff] %v1320_v29  ;;  %v284_v30 = vpop.permute.xlu0 %283 }
  0xcb   :  { %588 = vperm.xlu1 %825, %v1123_v42  }
  0xcc   :  { %608 = vperm.xlu0 %824, %v1178_v51  }
  0xcd   :  { %v1324_v31 = vpop.permute.xlu1 %268 }
  0xce   :  { %1560 = vst [vmem:[#allocation9_spill] sm:$0xff] %v1324_v31  ;;  %v294_v32 = vpop.permute.xlu0 %293 }
  0xcf   :  { %596 = vperm.xlu1 %825, %v1135_v44   ;;  %v23_v44 = vshrl.u32 %v22_v41, 7 }
  0xd0   :  { %616 = vperm.xlu0 %824, %v1190_v53  }
  0xd1   :  { %v1328_v33 = vpop.permute.xlu1 %278  ;;  %v33_v45 = vsub.s32 1, %v23_v44  ;;  %v24_v49 = vsub.s32 0, %v23_v44 }
  0xd2   :  { %1561 = vst [vmem:[#allocation10_spill] sm:$0xff] %v1328_v33  ;;  %v304_v34 = vpop.permute.xlu0 %303 }
  0xd3   :  { %604 = vperm.xlu1 %825, %v1147_v46  }
  0xd4   :  { %624 = vperm.xlu0 %824, %v1197_v55  }
  0xd5   :  { %v1332_v35 = vpop.permute.xlu1 %288 }
  0xd6   :  { %1562 = vst [vmem:[#allocation11_spill] sm:$0xff] %v1332_v35  ;;  %v314_v36 = vpop.permute.xlu0 %313 }
  0xd7   :  { %612 = vperm.xlu1 %825, %v1159_v48   ;;  %v16_v48 = vld [vmem:[%s1554_s2] sm:$0x3]  ;;  %s852_s2 = smov [#allocation2]  }
  0xd8   :  { %632 = vperm.xlu0 %824, %v1204_v56   ;;  %v34_v51 = vrot.slane %v16_v48, %v33_v45  ;;  %v25_v54 = vrot.slane %v16_v48, %v24_v49  ;;  %s806_s11 = sshll.u32 %s852_s2, 4  ;;  %s807_s11 = int_to_ptr.vmem [resolvable:$true] %s806_s11 }
  0xd9   :  { %v299_v37 = vpop.permute.xlu1 %298  ;;  %s826_s12 = scalar_lea.vmem %s807_s11, 6912  ;;  %p831_p1 = scmp.lt.s32.totalorder %s807_s11, %s807_s11 }
  0xda   :  { %v324_v38 = vpop.permute.xlu0 %323  ;;  %v26_v35 = vmul.f32 %v25_v54, %v1216_v58  ;;  %p827_p0 = scmp.ne.s32.totalorder %s807_s11, %s826_s12  ;;  %p832_p2 = scmp.lt.s32.totalorder %s826_s12, %s826_s12 }
  0xdb   :  { %620 = vperm.xlu1 %825, %v1171_v50  }
  0xdc   :  { %p833_p3 = por %p832_p2, %p831_p1 }
  0xdd   :  { %v309_v39 = vpop.permute.xlu1 %308 }
  0xde   :  { %v334_v40 = vpop.permute.xlu0 %333  ;;  %p834_p4 = pnand %p833_p3, %p827_p0 }
  0xdf   :  { %628 = vperm.xlu1 %825, %v1183_v52  }
  0xe1   :  { %v319_v42 = vpop.permute.xlu1 %318 }
  0xe2   :  { %v344_v43 = vpop.permute.xlu0 %343 }
  0xe5   :  { %v329_v46 = vpop.permute.xlu1 %328 }
  0xe6   :  { %v354_v47 = vpop.permute.xlu0 %353 }
  0xe9   :  { %v339_v53 = vpop.permute.xlu1 %338 }
  0xeb   :  { %v29_v50 = vpop.permute.xlu0 %28 }
  0xec   :  { %v35_v55 = vmul.f32 %v34_v51, %v29_v50 }
  0xed   :  { %v349_v56 = vpop.permute.xlu1 %348 }
  0xee   :  { %v36_v26 = vadd.f32 %v35_v55, %v26_v35 }
  0xef   :  { %v421_v52 = vpop.permute.xlu0 %420 }
  0xf0   :  { %v1342_v24 = vrot.slane %v36_v26, %v24_v49  ;;  %v1344_v22 = vrot.slane %v36_v26, %v33_v45 }
  0xf1   :  { %v359_v33 = vpop.permute.xlu1 %358 }
  0xf2   :  { %v365_v29 = vmul.f32 %v1342_v24, %v1214_v57  ;;  %v366_v48 = vmul.f32 %v1342_v24, %v1220_v59  ;;  %v367_v51 = vmul.f32 %v1342_v24, %v1226_v61  ;;  %v368_v58 = vmul.f32 %v1342_v24, %v1222_v60 }
  0xf3   :  { %v433_v41 = vpop.permute.xlu0 %432  ;;  %v369_v35 = vmul.f32 %v1342_v24, %v1232_v63  ;;  %v370_v49 = vmul.f32 %v1342_v24, %v1238_v1  ;;  %v372_v26 = vmul.f32 %v1342_v24, %v1244_v3  ;;  %v374_v57 = vmul.f32 %v1342_v24, %v1250_v5 }
  0xf4   :  { %v1363_v59 = vmul.f32 %v1342_v24, %v274_v28  ;;  %v1366_v61 = vmul.f32 %v1342_v24, %v284_v30  ;;  %v1369_v54 = vmul.f32 %v1342_v24, %v294_v32  ;;  %v1372_v63 = vmul.f32 %v1342_v24, %v299_v37 }
  0xf5   :  { %v1375_v1 = vmul.f32 %v1342_v24, %v304_v34  ;;  %v1378_v3 = vmul.f32 %v1342_v24, %v309_v39  ;;  %v1381_v5 = vmul.f32 %v1342_v24, %v314_v36  ;;  %v1384_v28 = vmul.f32 %v1342_v24, %v319_v42 }
  0xf6   :  { %v425_v31 = vpop.permute.xlu1 %424  ;;  %v1387_v30 = vmul.f32 %v1342_v24, %v324_v38  ;;  %v1390_v32 = vmul.f32 %v1342_v24, %v329_v46  ;;  %v1393_v37 = vmul.f32 %v1342_v24, %v334_v40  ;;  %v1396_v34 = vmul.f32 %v1342_v24, %v339_v53 }
  0xf7   :  { %v441_v44 = vpop.permute.xlu0 %440  ;;  %v1399_v39 = vmul.f32 %v1342_v24, %v344_v43  ;;  %v1402_v36 = vmul.f32 %v1342_v24, %v354_v47  ;;  %v1405_v42 = vmul.f32 %v1342_v24, %v349_v56  ;;  %v639_v38 = vmul.f32 %v1344_v22, %v421_v52 }
  0xf8   :  { %1563 = vst [vmem:[#allocation12_spill] sm:$0xff] %v1387_v30  ;;  %1564 = vst [vmem:[#allocation13_spill] sm:$0xff] %v1393_v37  ;;  %v1409_v46 = vmul.f32 %v1342_v24, %v359_v33  ;;  %v642_v40 = vmul.f32 %v1344_v22, %v433_v41  ;;  %v640_v53 = vmul.f32 %v1344_v22, %v425_v31 }
  0xf9   :  { %1565 = vst [vmem:[#allocation14_spill] sm:$0xff] %v1396_v34  ;;  %1566 = vst [vmem:[#allocation15_spill] sm:$0xff] %v1399_v39  ;;  %v644_v43 = vmul.f32 %v1344_v22, %v441_v44 }
  0xfa   :  { %v429_v45 = vpop.permute.xlu1 %428  ;;  %1567 = vst [vmem:[#allocation16_spill] sm:$0xff] %v1402_v36  ;;  %1568 = vst [vmem:[#allocation17_spill] sm:$0xff] %v1405_v42  ;;  %v693_v36 = vadd.f32 %v639_v38, %v365_v29  ;;  %v696_v56 = vadd.f32 %v642_v40, %v368_v58  ;;  %v694_v33 = vadd.f32 %v640_v53, %v366_v48 }
  0xfb   :  { %v449_v60 = vpop.permute.xlu0 %448  ;;  %1569 = vst [vmem:[#allocation18_spill] sm:$0xff] %v1409_v46  ;;  %v641_v39 = vmul.f32 %v1344_v22, %v429_v45  ;;  %v698_v46 = vadd.f32 %v644_v43, %v370_v49  ;;  %v371_v45 = vmul.f32 %v1342_v24, %v1228_v62  ;;  %v376_v29 = vmul.f32 %v1342_v24, %v1256_v7 }
  0xfc   :  { %v646_v47 = vmul.f32 %v1344_v22, %v449_v60  ;;  %747 = vst [vmem:[#allocation2] sm:$0xff] %v693_v36  ;;  %750 = vst [vmem:[#allocation2 + $0x18] sm:$0xff] %v696_v56  ;;  %v373_v62 = vmul.f32 %v1342_v24, %v1234_v0  ;;  %v378_v7 = vmul.f32 %v1342_v24, %v1262_v9 }
  0xfd   :  { %v695_v42 = vadd.f32 %v641_v39, %v367_v51  ;;  %748 = vst [vmem:[#allocation2 + $0x8] sm:$0xff] %v694_v33  ;;  %752 = vst [vmem:[#allocation2 + $0x28] sm:$0xff] %v698_v46  ;;  %v375_v36 = vmul.f32 %v1342_v24, %v1240_v2  ;;  %v382_v53 = vmul.f32 %v1342_v24, %v1274_v13 }
  0xfe   :  { %v437_v50 = vpop.permute.xlu1 %436  ;;  %v700_v41 = vadd.f32 %v646_v47, %v372_v26  ;;  %v379_v33 = vmul.f32 %v1342_v24, %v1252_v6 }
  0xff   :  { %v457_v55 = vpop.permute.xlu0 %456  ;;  %v643_v37 = vmul.f32 %v1344_v22, %v437_v50  ;;  %749 = vst [vmem:[#allocation2 + $0x10] sm:$0xff] %v695_v42  ;;  %v380_v42 = vmul.f32 %v1342_v24, %v1268_v11 }
 0x100   :  { %v648_v52 = vmul.f32 %v1344_v22, %v457_v55  ;;  %754 = vst [vmem:[#allocation2 + $0x38] sm:$0xff] %v700_v41  ;;  %v377_v55 = vmul.f32 %v1342_v24, %v1246_v4  ;;  %v384_v41 = vmul.f32 %v1342_v24, %v1280_v15 }
 0x101   :  { %v697_v30 = vadd.f32 %v643_v37, %v369_v35 }
 0x102   :  { %v702_v31 = vadd.f32 %v648_v52, %v374_v57  ;;  %v445_v34 = vpop.permute.xlu1 %444 }
 0x103   :  { %v465_v44 = vpop.permute.xlu0 %464  ;;  %v645_v48 = vmul.f32 %v1344_v22, %v445_v34  ;;  %751 = vst [vmem:[#allocation2 + $0x20] sm:$0xff] %v697_v30 }
 0x104   :  { %v650_v51 = vmul.f32 %v1344_v22, %v465_v44  ;;  %756 = vst [vmem:[#allocation2 + $0x48] sm:$0xff] %v702_v31 }
 0x105   :  { %v699_v58 = vadd.f32 %v645_v48, %v371_v45  ;;  %v381_v48 = vmul.f32 %v1342_v24, %v1258_v8 }
 0x106   :  { %v704_v35 = vadd.f32 %v650_v51, %v376_v29  ;;  %v453_v49 = vpop.permute.xlu1 %452  ;;  %v386_v51 = vmul.f32 %v1342_v24, %v1286_v17 }
 0x107   :  { %v473_v26 = vpop.permute.xlu0 %472  ;;  %753 = vst [vmem:[#allocation2 + $0x30] sm:$0xff] %v699_v58  ;;  %v647_v57 = vmul.f32 %v1344_v22, %v453_v49 }
 0x108   :  { %758 = vst [vmem:[#allocation2 + $0x58] sm:$0xff] %v704_v35  ;;  %v652_v60 = vmul.f32 %v1344_v22, %v473_v26 }
 0x109   :  { %v701_v37 = vadd.f32 %v647_v57, %v373_v62  ;;  %v383_v62 = vmul.f32 %v1342_v24, %v1264_v10 }
 0x10a   :  { %v706_v34 = vadd.f32 %v652_v60, %v378_v7  ;;  %v461_v30 = vpop.permute.xlu1 %460  ;;  %v388_v7 = vmul.f32 %v1342_v24, %v1292_v19 }
 0x10b   :  { %v481_v39 = vpop.permute.xlu0 %480  ;;  %755 = vst [vmem:[#allocation2 + $0x40] sm:$0xff] %v701_v37  ;;  %v649_v0 = vmul.f32 %v1344_v22, %v461_v30  ;;  %v385_v30 = vmul.f32 %v1342_v24, %v1270_v12 }
 0x10c   :  { %760 = vst [vmem:[#allocation2 + $0x68] sm:$0xff] %v706_v34  ;;  %v654_v9 = vmul.f32 %v1344_v22, %v481_v39  ;;  %v390_v39 = vmul.f32 %v1342_v24, %v1298_v21 }
 0x10d   :  { %v703_v38 = vadd.f32 %v649_v0, %v375_v36 }
 0x10e   :  { %v708_v46 = vadd.f32 %v654_v9, %v380_v42  ;;  %v469_v40 = vpop.permute.xlu1 %468 }
 0x10f   :  { %v489_v50 = vpop.permute.xlu0 %488  ;;  %757 = vst [vmem:[#allocation2 + $0x50] sm:$0xff] %v703_v38  ;;  %v651_v2 = vmul.f32 %v1344_v22, %v469_v40  ;;  %v387_v38 = vmul.f32 %v1342_v24, %v1276_v14 }
 0x110   :  { %762 = vst [vmem:[#allocation2 + $0x78] sm:$0xff] %v708_v46  ;;  %v656_v11 = vmul.f32 %v1344_v22, %v489_v50  ;;  %v392_v46 = vmul.f32 %v1342_v24, %v1304_v23 }
 0x111   :  { %v705_v43 = vadd.f32 %v651_v2, %v377_v55  ;;  %v389_v2 = vmul.f32 %v1342_v24, %v1282_v16 }
 0x112   :  { %v710_v47 = vadd.f32 %v656_v11, %v382_v53  ;;  %v477_v56 = vpop.permute.xlu1 %476  ;;  %v394_v11 = vmul.f32 %v1342_v24, %v1310_v25 }
 0x113   :  { %v497_v52 = vpop.permute.xlu0 %496  ;;  %759 = vst [vmem:[#allocation2 + $0x60] sm:$0xff] %v705_v43  ;;  %v653_v4 = vmul.f32 %v1344_v22, %v477_v56 }
 0x114   :  { %764 = vst [vmem:[#allocation2 + $0x88] sm:$0xff] %v710_v47  ;;  %v658_v13 = vmul.f32 %v1344_v22, %v497_v52 }
 0x115   :  { %v707_v31 = vadd.f32 %v653_v4, %v379_v33  ;;  %v391_v33 = vmul.f32 %v1342_v24, %v1288_v18 }
 0x116   :  { %v712_v44 = vadd.f32 %v658_v13, %v384_v41  ;;  %v485_v45 = vpop.permute.xlu1 %484  ;;  %v396_v41 = vmul.f32 %v1342_v24, %v1316_v27 }
 0x117   :  { %v505_v29 = vpop.permute.xlu0 %504  ;;  %761 = vst [vmem:[#allocation2 + $0x70] sm:$0xff] %v707_v31  ;;  %v655_v6 = vmul.f32 %v1344_v22, %v485_v45  ;;  %v393_v45 = vmul.f32 %v1342_v24, %v1294_v20 }
 0x118   :  { %766 = vst [vmem:[#allocation2 + $0x98] sm:$0xff] %v712_v44  ;;  %v660_v15 = vmul.f32 %v1344_v22, %v505_v29  ;;  %v1570_v29 = vld [vmem:[#allocation8_spill] sm:$0xff] }
 0x119   :  { %v709_v58 = vadd.f32 %v655_v6, %v381_v48  ;;  %v398_v48 = vmul.f32 %v1342_v24, %v1570_v29 }
 0x11a   :  { %v714_v35 = vadd.f32 %v660_v15, %v386_v51  ;;  %v493_v49 = vpop.permute.xlu1 %492 }
 0x11b   :  { %v513_v26 = vpop.permute.xlu0 %512  ;;  %763 = vst [vmem:[#allocation2 + $0x80] sm:$0xff] %v709_v58  ;;  %v657_v8 = vmul.f32 %v1344_v22, %v493_v49 }
 0x11c   :  { %768 = vst [vmem:[#allocation2 + $0xa8] sm:$0xff] %v714_v35  ;;  %v662_v17 = vmul.f32 %v1344_v22, %v513_v26  ;;  %v1571_v35 = vld [vmem:[#allocation5_spill] sm:$0xff] }
 0x11d   :  { %v711_v57 = vadd.f32 %v657_v8, %v383_v62  ;;  %v395_v49 = vmul.f32 %v1342_v24, %v1571_v35  ;;  %v1572_v26 = vld [vmem:[#allocation9_spill] sm:$0xff] }
 0x11e   :  { %v716_v60 = vadd.f32 %v662_v17, %v388_v7  ;;  %v501_v37 = vpop.permute.xlu1 %500  ;;  %v400_v62 = vmul.f32 %v1342_v24, %v1572_v26 }
 0x11f   :  { %v521_v34 = vpop.permute.xlu0 %520  ;;  %765 = vst [vmem:[#allocation2 + $0x90] sm:$0xff] %v711_v57  ;;  %v659_v10 = vmul.f32 %v1344_v22, %v501_v37  ;;  %v1573_v37 = vld [vmem:[#allocation6_spill] sm:$0xff] }
 0x120   :  { %770 = vst [vmem:[#allocation2 + $0xb8] sm:$0xff] %v716_v60  ;;  %v664_v19 = vmul.f32 %v1344_v22, %v521_v34  ;;  %v397_v34 = vmul.f32 %v1342_v24, %v1573_v37  ;;  %v1581_v37 = vld [vmem:[#allocation18_spill] sm:$0xff] }
 0x121   :  { %v713_v36 = vadd.f32 %v659_v10, %v385_v30  ;;  %v1574_v30 = vld [vmem:[#allocation10_spill] sm:$0xff] }
 0x122   :  { %v718_v42 = vadd.f32 %v664_v19, %v390_v39  ;;  %v509_v0 = vpop.permute.xlu1 %508  ;;  %v402_v39 = vmul.f32 %v1342_v24, %v1574_v30 }
 0x123   :  { %v529_v9 = vpop.permute.xlu0 %528  ;;  %767 = vst [vmem:[#allocation2 + $0xa0] sm:$0xff] %v713_v36  ;;  %v661_v12 = vmul.f32 %v1344_v22, %v509_v0 }
 0x124   :  { %772 = vst [vmem:[#allocation2 + $0xc8] sm:$0xff] %v718_v42  ;;  %v666_v21 = vmul.f32 %v1344_v22, %v529_v9 }
 0x125   :  { %v715_v40 = vadd.f32 %v661_v12, %v387_v38  ;;  %v1575_v38 = vld [vmem:[#allocation7_spill] sm:$0xff] }
 0x126   :  { %v720_v50 = vadd.f32 %v666_v21, %v392_v46  ;;  %v517_v55 = vpop.permute.xlu1 %516  ;;  %v399_v46 = vmul.f32 %v1342_v24, %v1575_v38  ;;  %v1576_v12 = vld [vmem:[#allocation11_spill] sm:$0xff] }
 0x127   :  { %v537_v53 = vpop.permute.xlu0 %536  ;;  %769 = vst [vmem:[#allocation2 + $0xb0] sm:$0xff] %v715_v40  ;;  %v663_v14 = vmul.f32 %v1344_v22, %v517_v55  ;;  %v404_v21 = vmul.f32 %v1342_v24, %v1576_v12 }
 0x128   :  { %774 = vst [vmem:[#allocation2 + $0xd8] sm:$0xff] %v720_v50  ;;  %v668_v23 = vmul.f32 %v1344_v22, %v537_v53 }
 0x129   :  { %v717_v43 = vadd.f32 %v663_v14, %v389_v2 }
 0x12a   :  { %v722_v47 = vadd.f32 %v668_v23, %v394_v11  ;;  %v525_v56 = vpop.permute.xlu1 %524 }
 0x12b   :  { %v545_v52 = vpop.permute.xlu0 %544  ;;  %771 = vst [vmem:[#allocation2 + $0xc0] sm:$0xff] %v717_v43  ;;  %v665_v16 = vmul.f32 %v1344_v22, %v525_v56 }
 0x12c   :  { %776 = vst [vmem:[#allocation2 + $0xe8] sm:$0xff] %v722_v47  ;;  %v670_v25 = vmul.f32 %v1344_v22, %v545_v52 }
 0x12d   :  { %v719_v4 = vadd.f32 %v665_v16, %v391_v33 }
 0x12e   :  { %v724_v13 = vadd.f32 %v670_v25, %v396_v41  ;;  %v533_v31 = vpop.permute.xlu1 %532 }
 0x12f   :  { %v553_v44 = vpop.permute.xlu0 %552  ;;  %773 = vst [vmem:[#allocation2 + $0xd0] sm:$0xff] %v719_v4  ;;  %v667_v18 = vmul.f32 %v1344_v22, %v533_v31 }
 0x130   :  { %778 = vst [vmem:[#allocation2 + $0xf8] sm:$0xff] %v724_v13  ;;  %v672_v27 = vmul.f32 %v1344_v22, %v553_v44 }
 0x131   :  { %v721_v51 = vadd.f32 %v667_v18, %v393_v45 }
 0x132   :  { %v726_v6 = vadd.f32 %v672_v27, %v398_v48  ;;  %v541_v15 = vpop.permute.xlu1 %540 }
 0x133   :  { %v561_v58 = vpop.permute.xlu0 %560  ;;  %775 = vst [vmem:[#allocation2 + $0xe0] sm:$0xff] %v721_v51  ;;  %v669_v20 = vmul.f32 %v1344_v22, %v541_v15 }
 0x134   :  { %780 = vst [vmem:[#allocation2 + $0x108] sm:$0xff] %v726_v6  ;;  %v674_v7 = vmul.f32 %v1344_v22, %v561_v58  ;;  %v1577_v6 = vld [vmem:[#allocation14_spill] sm:$0xff] }
 0x135   :  { %v723_v8 = vadd.f32 %v669_v20, %v395_v49  ;;  %v1578_v49 = vld [vmem:[#allocation12_spill] sm:$0xff] }
 0x136   :  { %v728_v17 = vadd.f32 %v674_v7, %v400_v62  ;;  %v549_v57 = vpop.permute.xlu1 %548  ;;  %v1579_v62 = vld [vmem:[#allocation17_spill] sm:$0xff] }
 0x137   :  { %v569_v60 = vpop.permute.xlu0 %568  ;;  %777 = vst [vmem:[#allocation2 + $0xf0] sm:$0xff] %v723_v8  ;;  %v671_v10 = vmul.f32 %v1344_v22, %v549_v57  ;;  %v1580_v57 = vld [vmem:[#allocation13_spill] sm:$0xff] }
 0x138   :  { %782 = vst [vmem:[#allocation2 + $0x118] sm:$0xff] %v728_v17  ;;  %v676_v19 = vmul.f32 %v1344_v22, %v569_v60 }
 0x139   :  { %v725_v36 = vadd.f32 %v671_v10, %v397_v34  ;;  %v1582_v10 = vld [vmem:[#allocation15_spill] sm:$0xff] }
 0x13a   :  { %v730_v42 = vadd.f32 %v676_v19, %v402_v39  ;;  %v557_v0 = vpop.permute.xlu1 %556 }
 0x13b   :  { %v577_v9 = vpop.permute.xlu0 %576  ;;  %779 = vst [vmem:[#allocation2 + $0x100] sm:$0xff] %v725_v36  ;;  %v673_v40 = vmul.f32 %v1344_v22, %v557_v0  ;;  %v1583_v0 = vld [vmem:[#allocation16_spill] sm:$0xff] }
 0x13c   :  { %784 = vst [vmem:[#allocation2 + $0x128] sm:$0xff] %v730_v42  ;;  %v678_v50 = vmul.f32 %v1344_v22, %v577_v9 }
 0x13d   :  { %v727_v55 = vadd.f32 %v673_v40, %v399_v46 }
 0x13e   :  { %v732_v53 = vadd.f32 %v678_v50, %v404_v21  ;;  %v565_v2 = vpop.permute.xlu1 %564 }
 0x13f   :  { %v585_v11 = vpop.permute.xlu0 %584  ;;  %781 = vst [vmem:[#allocation2 + $0x110] sm:$0xff] %v727_v55  ;;  %v675_v14 = vmul.f32 %v1344_v22, %v565_v2 }
 0x140   :  { %786 = vst [vmem:[#allocation2 + $0x138] sm:$0xff] %v732_v53  ;;  %v680_v23 = vmul.f32 %v1344_v22, %v585_v11 }
 0x141   :  { %v729_v43 = vadd.f32 %v675_v14, %v1363_v59 }
 0x142   :  { %v734_v24 = vadd.f32 %v680_v23, %v1372_v63  ;;  %v573_v47 = vpop.permute.xlu1 %572 }
 0x143   :  { %v593_v56 = vpop.permute.xlu0 %592  ;;  %783 = vst [vmem:[#allocation2 + $0x120] sm:$0xff] %v729_v43  ;;  %v677_v52 = vmul.f32 %v1344_v22, %v573_v47 }
 0x144   :  { %788 = vst [vmem:[#allocation2 + $0x148] sm:$0xff] %v734_v24  ;;  %v682_v33 = vmul.f32 %v1344_v22, %v593_v56 }
 0x145   :  { %v731_v41 = vadd.f32 %v677_v52, %v1366_v61 }
 0x146   :  { %v736_v16 = vadd.f32 %v682_v33, %v1378_v3  ;;  %v581_v25 = vpop.permute.xlu1 %580 }
 0x147   :  { %v601_v4 = vpop.permute.xlu0 %600  ;;  %785 = vst [vmem:[#allocation2 + $0x130] sm:$0xff] %v731_v41  ;;  %v679_v59 = vmul.f32 %v1344_v22, %v581_v25 }
 0x148   :  { %790 = vst [vmem:[#allocation2 + $0x158] sm:$0xff] %v736_v16  ;;  %v684_v63 = vmul.f32 %v1344_v22, %v601_v4 }
 0x149   :  { %v733_v13 = vadd.f32 %v679_v59, %v1369_v54 }
 0x14a   :  { %v738_v31 = vadd.f32 %v684_v63, %v1384_v28  ;;  %v589_v44 = vpop.permute.xlu1 %588 }
 0x14b   :  { %v609_v45 = vpop.permute.xlu0 %608  ;;  %787 = vst [vmem:[#allocation2 + $0x140] sm:$0xff] %v733_v13  ;;  %v681_v61 = vmul.f32 %v1344_v22, %v589_v44 }
 0x14c   :  { %792 = vst [vmem:[#allocation2 + $0x168] sm:$0xff] %v738_v31  ;;  %v686_v3 = vmul.f32 %v1344_v22, %v609_v45 }
 0x14d   :  { %v735_v29 = vadd.f32 %v681_v61, %v1375_v1 }
 0x14e   :  { %v740_v48 = vadd.f32 %v686_v3, %v1390_v32  ;;  %v597_v18 = vpop.permute.xlu1 %596 }
 0x14f   :  { %v617_v27 = vpop.permute.xlu0 %616  ;;  %789 = vst [vmem:[#allocation2 + $0x150] sm:$0xff] %v735_v29  ;;  %v683_v54 = vmul.f32 %v1344_v22, %v597_v18 }
 0x150   :  { %794 = vst [vmem:[#allocation2 + $0x178] sm:$0xff] %v740_v48  ;;  %v688_v28 = vmul.f32 %v1344_v22, %v617_v27 }
 0x151   :  { %v737_v51 = vadd.f32 %v683_v54, %v1381_v5 }
 0x152   :  { %v742_v15 = vadd.f32 %v688_v28, %v1577_v6  ;;  %v605_v58 = vpop.permute.xlu1 %604 }
 0x153   :  { %v625_v35 = vpop.permute.xlu0 %624  ;;  %791 = vst [vmem:[#allocation2 + $0x160] sm:$0xff] %v737_v51  ;;  %v685_v1 = vmul.f32 %v1344_v22, %v605_v58 }
 0x154   :  { %796 = vst [vmem:[#allocation2 + $0x188] sm:$0xff] %v742_v15  ;;  %v690_v32 = vmul.f32 %v1344_v22, %v625_v35 }
 0x155   :  { %v739_v26 = vadd.f32 %v685_v1, %v1578_v49 }
 0x156   :  { %v744_v20 = vadd.f32 %v690_v32, %v1579_v62  ;;  %v613_v7 = vpop.permute.xlu1 %612 }
 0x157   :  { %v633_v8 = vpop.permute.xlu0 %632  ;;  %793 = vst [vmem:[#allocation2 + $0x170] sm:$0xff] %v739_v26  ;;  %v687_v5 = vmul.f32 %v1344_v22, %v613_v7 }
 0x158   :  { %798 = vst [vmem:[#allocation2 + $0x198] sm:$0xff] %v744_v20  ;;  %v692_v17 = vmul.f32 %v1344_v22, %v633_v8 }
 0x159   :  { %v741_v60 = vadd.f32 %v687_v5, %v1580_v57 }
 0x15a   :  { %v746_v34 = vadd.f32 %v692_v17, %v1581_v37  ;;  %v621_v30 = vpop.permute.xlu1 %620 }
 0x15b   :  { %795 = vst [vmem:[#allocation2 + $0x180] sm:$0xff] %v741_v60  ;;  %v689_v39 = vmul.f32 %v1344_v22, %v621_v30 }
 0x15c   :  { %800 = vst [vmem:[#allocation2 + $0x1a8] sm:$0xff] %v746_v34 }
 0x15d   :  { %v743_v19 = vadd.f32 %v689_v39, %v1582_v10 }
 0x15e   :  { %v629_v36 = vpop.permute.xlu1 %628 }
 0x15f   :  { %797 = vst [vmem:[#allocation2 + $0x190] sm:$0xff] %v743_v19  ;;  %v691_v42 = vmul.f32 %v1344_v22, %v629_v36 }
 0x161   :  { %v745_v9 = vadd.f32 %v691_v42, %v1583_v0 }
 0x163   :  { %799 = vst [vmem:[#allocation2 + $0x1a0] sm:$0xff] %v745_v9 }
 0x164   :  { %837 = shalt.err (!%p834_p4)
}
 0x165   :  { %s838_s15 = scalar_lea.hbm %s1555_s3, 6912 }
 0x166   :  { %p839_p5 = scmp.ne.s32.totalorder %s1555_s3, %s838_s15  ;;  %p842_p6 = scmp.lt.u32.totalorder %s838_s15, %s1555_s3 }
 0x168   :  { %p844_p7 = pnand %p842_p6, %p839_p5 }
 0x16a   :  { %847 = shalt.err (!%p844_p7)
}
 0x16b   :  { %s853_s1 = smov 128   ;;  %s854_s20 = smov 8  }
 0x16c   :  { %812 = dma.vmem_to_hbm [thread:$0]  %s807_s11, 6912, %s1555_s3, [#allocation3], %s853_s1, %s853_s1, %s854_s20  }
 0x16d   :  { %848 = dma.done.wait [#allocation3], 6912  }
 0x16e   :  { %849 = vsyncadd [#allocation3], 4294960384 }
 0x16f   :  { %816 = vsyncpa [#allocation3], 1 }

</bundles_post_ra>
